<compile_context>
chip_gen: v5e
topology: v5e:2x2
jax: 0.10.0
libtpu: 0.0.40
codegen_flags: <defaults>
</compile_context>

<pallas_src>
from functools import partial

import jax
import jax.numpy as jnp
from jax.experimental import pallas as pl
from jax.experimental.pallas import tpu as pltpu

STATE_SIZE = 80
ACTION_SIZE = 20
HIDDEN_SIZE = 128

LANE = 128                      # full lane tile width
COMPUTE_DTYPE = jnp.bfloat16    # MXU operand dtype (f32 accumulate / epilogue)


def _round_up(n, m):
    return ((n + m - 1) // m) * m


def _batch_tiling(batch):
    """Pick (rows-per-grid-step TB, padded batch B_pad), B_pad % TB == 0.

    Small batches: a single grid step, rounded up to 8 sublanes only
    (avoids 16x wasted MXU/DMA work on the latency-critical serving path).
    Large batches: large tiles (per-grid-step overhead ~0.35us dominates the
    tiny per-tile compute), capped at 2048 rows and kept at >=2 tiles so the
    "parallel" batch axis can shard across v7x's two TensorCores.
    """
    b8 = _round_up(batch, 8)
    if b8 <= 256:
        tb = b8
    else:
        tb = min(2048, _round_up(-(-b8 // 2), 8))
    return tb, _round_up(b8, tb)


def dqn_kernel(x_ref, w1_ref, b1_ref, w2_ref, b2_ref, w3_ref, b3_ref, o_ref):
    cd = w1_ref.dtype  # bf16 operands -> MXU; f32 accumulate + f32 epilogue
    # Layer 1: Linear(state -> hidden) + ReLU
    h1 = jnp.dot(x_ref[...].astype(cd), w1_ref[...],
                 preferred_element_type=jnp.float32)
    h1 = jnp.maximum(h1 + b1_ref[...], 0.0)
    # Layer 2: Linear(hidden -> hidden) + ReLU
    h2 = jnp.dot(h1.astype(cd), w2_ref[...],
                 preferred_element_type=jnp.float32)
    h2 = jnp.maximum(h2 + b2_ref[...], 0.0)
    # Layer 3: Linear(hidden -> action_pad), no activation; lane-dense store.
    out = jnp.dot(h2.astype(cd), w3_ref[...],
                  preferred_element_type=jnp.float32)
    o_ref[...] = (out + b3_ref[...]).astype(o_ref.dtype)


def init_params(key, state_size, action_size, hidden_size):
    """f32 params, (in_features, out_features) layout (transposed vs PyTorch),
    nn.Linear-style uniform(+/- 1/sqrt(fan_in)) init."""
    ks = jax.random.split(key, 6)

    def lin(kw, kb, fan_in, fan_out):
        bound = 1.0 / jnp.sqrt(fan_in)
        w = jax.random.uniform(kw, (fan_in, fan_out), jnp.float32, -bound, bound)
        b = jax.random.uniform(kb, (1, fan_out), jnp.float32, -bound, bound)
        return w, b

    w1, b1 = lin(ks[0], ks[1], state_size, hidden_size)
    w2, b2 = lin(ks[2], ks[3], hidden_size, hidden_size)
    w3, b3 = lin(ks[4], ks[5], hidden_size, action_size)
    return (w1, b1, w2, b2, w3, b3)


def prepare_params(params, compute_dtype=COMPUTE_DTYPE):
    """One-time conversion to kernel layout: pad the action dim to a full
    128-lane tile and cast weights to the MXU operand dtype.  Done once at
    init so no pad/cast XLA launches happen per forward call."""
    w1, b1, w2, b2, w3, b3 = params
    a = w3.shape[1]
    a_pad = _round_up(a, LANE)
    w3p = jnp.pad(w3, ((0, 0), (0, a_pad - a)))
    b3p = jnp.pad(b3, ((0, 0), (0, a_pad - a)))
    return (w1.astype(compute_dtype), b1.astype(jnp.float32),
            w2.astype(compute_dtype), b2.astype(jnp.float32),
            w3p.astype(compute_dtype), b3p.astype(jnp.float32))


@partial(jax.jit, static_argnames=("action_size",))
def dqn_forward(x, kernel_params, action_size=ACTION_SIZE):
    w1, b1, w2, b2, w3, b3 = kernel_params
    batch, state = x.shape
    hidden = w1.shape[1]
    a_pad = w3.shape[1]

    tb, b_pad = _batch_tiling(batch)
    x_p = x if b_pad == batch else jnp.pad(x, ((0, b_pad - batch), (0, 0)))

    const = lambda i: (0, 0)  # weights/biases: same block each step -> VMEM resident

    cost = pl.CostEstimate(
        flops=2 * b_pad * (state * hidden + hidden * hidden + hidden * a_pad),
        transcendentals=0,
        bytes_accessed=(x_p.size * x_p.dtype.itemsize
                        + sum(int(p.size) * p.dtype.itemsize for p in kernel_params)
                        + b_pad * a_pad * 4),
    )

    out = pl.pallas_call(
        dqn_kernel,
        out_shape=jax.ShapeDtypeStruct((b_pad, a_pad), jnp.float32),
        grid=(b_pad // tb,),
        in_specs=[
            pl.BlockSpec((tb, state), lambda i: (i, 0)),   # x: tiled over batch
            pl.BlockSpec((state, hidden), const),          # w1
            pl.BlockSpec((1, hidden), const),              # b1
            pl.BlockSpec((hidden, hidden), const),         # w2
            pl.BlockSpec((1, hidden), const),              # b2
            pl.BlockSpec((hidden, a_pad), const),          # w3 (action dim padded)
            pl.BlockSpec((1, a_pad), const),               # b3 (action dim padded)
        ],
        out_specs=pl.BlockSpec((tb, a_pad), lambda i: (i, 0)),
        compiler_params=pltpu.CompilerParams(
            dimension_semantics=("parallel",)),
        cost_estimate=cost,
    )(x_p, w1, b1, w2, b2, w3, b3)

    # Padded action columns are exactly 0 and padded batch rows are discarded;
    # consumers that can take the padded (B_pad, 128) Q-table (with padded
    # lanes masked before argmax) may skip this slice entirely.
    return out[:batch, :action_size]


def dqn_reference_f32(x, params):
    w1, b1, w2, b2, w3, b3 = params
    h1 = jnp.maximum(x @ w1 + b1, 0.0)
    h2 = jnp.maximum(h1 @ w2 + b2, 0.0)
    return h2 @ w3 + b3


def dqn_reference_bf16(x, params, cd=COMPUTE_DTYPE):
    # Mirrors the kernel's precision policy (bf16 operands, f32 accumulate).
    w1, b1, w2, b2, w3, b3 = params
    h1 = jnp.maximum(jnp.dot(x.astype(cd), w1.astype(cd),
                             preferred_element_type=jnp.float32) + b1, 0.0)
    h2 = jnp.maximum(jnp.dot(h1.astype(cd), w2.astype(cd),
                             preferred_element_type=jnp.float32) + b2, 0.0)
    return jnp.dot(h2.astype(cd), w3.astype(cd),
                   preferred_element_type=jnp.float32) + b3


if __name__ == "__main__":
    key = jax.random.PRNGKey(0)
    k_params, k_x = jax.random.split(key)
    params_f32 = init_params(k_params, STATE_SIZE, ACTION_SIZE, HIDDEN_SIZE)
    kparams = prepare_params(params_f32)

    # Replay-sized batch: single big grid step.
    batch = 256
    x = jax.random.normal(k_x, (batch, STATE_SIZE), jnp.float32)
    out = jax.block_until_ready(dqn_forward(x, kparams))
    assert out.shape == (batch, ACTION_SIZE)
    ref32 = dqn_reference_f32(x, params_f32)
    ref16 = dqn_reference_bf16(x, params_f32)
    assert jnp.allclose(out, ref16, atol=1e-2, rtol=1e-2)
    assert jnp.allclose(out, ref32, atol=5e-2, rtol=5e-2)

    # Tiny serving batch: 8-sublane tile, one grid step (no 128-row padding).
    x_small = x[:8]
    out_small = jax.block_until_ready(dqn_forward(x_small, kparams))
    assert out_small.shape == (8, ACTION_SIZE)
    assert jnp.allclose(out_small, ref32[:8], atol=5e-2, rtol=5e-2)

    # Ragged larger batch: exercises batch padding + the >=2-tile (v7x) path.
    x_big = jnp.concatenate([x, x, x[:88]], axis=0)          # 600 rows
    out_big = jax.block_until_ready(dqn_forward(x_big, kparams))
    assert out_big.shape == (600, ACTION_SIZE)
    ref_big = dqn_reference_f32(x_big, params_f32)
    assert jnp.allclose(out_big, ref_big, atol=5e-2, rtol=5e-2)

    print("KERNEL_OK")
</pallas_src>

<mosaic_0001>
module attributes {stable_mosaic.version = 11 : i64} {
  func.func @dqn_kernel(%arg0: i32, %arg1: memref<256x80xf32, #tpu.memory_space<vmem>>, %arg2: memref<80x128xbf16, #tpu.memory_space<vmem>>, %arg3: memref<1x128xf32, #tpu.memory_space<vmem>>, %arg4: memref<128x128xbf16, #tpu.memory_space<vmem>>, %arg5: memref<1x128xf32, #tpu.memory_space<vmem>>, %arg6: memref<128x128xbf16, #tpu.memory_space<vmem>>, %arg7: memref<1x128xf32, #tpu.memory_space<vmem>>, %arg8: memref<256x128xf32, #tpu.memory_space<vmem>>) attributes {dimension_semantics = [#tpu.dimension_semantics<parallel>], iteration_bounds = array<i64: 1>, scalar_prefetch = 0 : i64, scratch_operands = 0 : i64, tpu.core_type = #tpu.core_type<tc>, window_params = [{transform_indices = @transform_0, window_bounds = array<i64: 256, 80>}, {pipeline_mode = #tpu.pipeline_mode<synchronous>, transform_indices = @transform_1, window_bounds = array<i64: 80, 128>}, {pipeline_mode = #tpu.pipeline_mode<synchronous>, transform_indices = @transform_2, window_bounds = array<i64: 1, 128>}, {pipeline_mode = #tpu.pipeline_mode<synchronous>, transform_indices = @transform_3, window_bounds = array<i64: 128, 128>}, {pipeline_mode = #tpu.pipeline_mode<synchronous>, transform_indices = @transform_4, window_bounds = array<i64: 1, 128>}, {pipeline_mode = #tpu.pipeline_mode<synchronous>, transform_indices = @transform_5, window_bounds = array<i64: 128, 128>}, {pipeline_mode = #tpu.pipeline_mode<synchronous>, transform_indices = @transform_6, window_bounds = array<i64: 1, 128>}, {transform_indices = @transform_7, window_bounds = array<i64: 256, 128>}]} {
    %c0 = arith.constant 0 : index
    %c0_0 = arith.constant 0 : index
    %0 = vector.load %arg1[%c0, %c0_0] : memref<256x80xf32, #tpu.memory_space<vmem>>, vector<256x80xf32>
    %1 = arith.truncf %0 : vector<256x80xf32> to vector<256x80xbf16>
    %c0_1 = arith.constant 0 : index
    %c0_2 = arith.constant 0 : index
    %2 = vector.load %arg2[%c0_1, %c0_2] : memref<80x128xbf16, #tpu.memory_space<vmem>>, vector<80x128xbf16>
    %cst = arith.constant dense<0.000000e+00> : vector<256x128xf32>
    %3 = tpu.matmul %1, %2, %cst {dimension_numbers = #tpu.dot_dimension_numbers<[1], [0], [0], [1], [0, 0, 1, 1], [], []>} : vector<256x80xbf16>, vector<80x128xbf16>, vector<256x128xf32> -> vector<256x128xf32>
    %c0_3 = arith.constant 0 : index
    %c0_4 = arith.constant 0 : index
    %4 = vector.load %arg3[%c0_3, %c0_4] : memref<1x128xf32, #tpu.memory_space<vmem>>, vector<1x128xf32>
    %5 = vector.broadcast %4 : vector<1x128xf32> to vector<256x128xf32>
    %6 = arith.addf %3, %5 : vector<256x128xf32>
    %cst_5 = arith.constant 0.000000e+00 : f32
    %7 = vector.broadcast %cst_5 : f32 to vector<256x128xf32>
    %8 = arith.maximumf %6, %7 : vector<256x128xf32>
    %9 = arith.truncf %8 : vector<256x128xf32> to vector<256x128xbf16>
    %c0_6 = arith.constant 0 : index
    %c0_7 = arith.constant 0 : index
    %10 = vector.load %arg4[%c0_6, %c0_7] : memref<128x128xbf16, #tpu.memory_space<vmem>>, vector<128x128xbf16>
    %cst_8 = arith.constant dense<0.000000e+00> : vector<256x128xf32>
    %11 = tpu.matmul %9, %10, %cst_8 {dimension_numbers = #tpu.dot_dimension_numbers<[1], [0], [0], [1], [0, 0, 1, 1], [], []>} : vector<256x128xbf16>, vector<128x128xbf16>, vector<256x128xf32> -> vector<256x128xf32>
    %c0_9 = arith.constant 0 : index
    %c0_10 = arith.constant 0 : index
    %12 = vector.load %arg5[%c0_9, %c0_10] : memref<1x128xf32, #tpu.memory_space<vmem>>, vector<1x128xf32>
    %13 = vector.broadcast %12 : vector<1x128xf32> to vector<256x128xf32>
    %14 = arith.addf %11, %13 : vector<256x128xf32>
    %cst_11 = arith.constant 0.000000e+00 : f32
    %15 = vector.broadcast %cst_11 : f32 to vector<256x128xf32>
    %16 = arith.maximumf %14, %15 : vector<256x128xf32>
    %17 = arith.truncf %16 : vector<256x128xf32> to vector<256x128xbf16>
    %c0_12 = arith.constant 0 : index
    %c0_13 = arith.constant 0 : index
    %18 = vector.load %arg6[%c0_12, %c0_13] : memref<128x128xbf16, #tpu.memory_space<vmem>>, vector<128x128xbf16>
    %cst_14 = arith.constant dense<0.000000e+00> : vector<256x128xf32>
    %19 = tpu.matmul %17, %18, %cst_14 {dimension_numbers = #tpu.dot_dimension_numbers<[1], [0], [0], [1], [0, 0, 1, 1], [], []>} : vector<256x128xbf16>, vector<128x128xbf16>, vector<256x128xf32> -> vector<256x128xf32>
    %c0_15 = arith.constant 0 : index
    %c0_16 = arith.constant 0 : index
    %20 = vector.load %arg7[%c0_15, %c0_16] : memref<1x128xf32, #tpu.memory_space<vmem>>, vector<1x128xf32>
    %21 = vector.broadcast %20 : vector<1x128xf32> to vector<256x128xf32>
    %22 = arith.addf %19, %21 : vector<256x128xf32>
    %c0_17 = arith.constant 0 : index
    %c0_18 = arith.constant 0 : index
    %23 = vector.load %arg8[%c0_17, %c0_18] : memref<256x128xf32, #tpu.memory_space<vmem>>, vector<256x128xf32>
    tpu.vector_store %arg8[%c0_17, %c0_18], %22 {strides = array<i32>} : memref<256x128xf32, #tpu.memory_space<vmem>>, vector<256x128xf32>,
    return
  }
  func.func @transform_0(%arg0: i32) -> (i32, i32) {
    %c0_i32 = arith.constant 0 : i32
    %c0_i32_0 = arith.constant 0 : i32
    return %arg0, %c0_i32 : i32, i32
  }
  func.func @transform_1(%arg0: i32) -> (i32, i32) {
    %c0_i32 = arith.constant 0 : i32
    %c0_i32_0 = arith.constant 0 : i32
    %c0_i32_1 = arith.constant 0 : i32
    return %c0_i32, %c0_i32_0 : i32, i32
  }
  func.func @transform_2(%arg0: i32) -> (i32, i32) {
    %c0_i32 = arith.constant 0 : i32
    %c0_i32_0 = arith.constant 0 : i32
    %c0_i32_1 = arith.constant 0 : i32
    return %c0_i32, %c0_i32_0 : i32, i32
  }
  func.func @transform_3(%arg0: i32) -> (i32, i32) {
    %c0_i32 = arith.constant 0 : i32
    %c0_i32_0 = arith.constant 0 : i32
    %c0_i32_1 = arith.constant 0 : i32
    return %c0_i32, %c0_i32_0 : i32, i32
  }
  func.func @transform_4(%arg0: i32) -> (i32, i32) {
    %c0_i32 = arith.constant 0 : i32
    %c0_i32_0 = arith.constant 0 : i32
    %c0_i32_1 = arith.constant 0 : i32
    return %c0_i32, %c0_i32_0 : i32, i32
  }
  func.func @transform_5(%arg0: i32) -> (i32, i32) {
    %c0_i32 = arith.constant 0 : i32
    %c0_i32_0 = arith.constant 0 : i32
    %c0_i32_1 = arith.constant 0 : i32
    return %c0_i32, %c0_i32_0 : i32, i32
  }
  func.func @transform_6(%arg0: i32) -> (i32, i32) {
    %c0_i32 = arith.constant 0 : i32
    %c0_i32_0 = arith.constant 0 : i32
    %c0_i32_1 = arith.constant 0 : i32
    return %c0_i32, %c0_i32_0 : i32, i32
  }
  func.func @transform_7(%arg0: i32) -> (i32, i32) {
    %c0_i32 = arith.constant 0 : i32
    %c0_i32_0 = arith.constant 0 : i32
    return %arg0, %c0_i32 : i32, i32
  }
}

</mosaic_0001>

<bundles_post_ra>
// kernel: dqn_forward.1
= control target key start
LH: loop header
LB: loop body
LE: loop exit
PB: predicated region body
PF: predicated region fallthrough
CT: control target
= control target key end

     0   :  { %vm119_vm0 = vcmask 654336   ;;  %s1270_s1 = inlined_call_operand.vmem [shape: bf16[80,128], index: 1, kind: input, shape index: {}]   ;;  %s1271_s2 = inlined_call_operand.vmem [shape: f32[1,128], index: 2, kind: input, shape index: {}]   ;;  %s1272_s0 = inlined_call_operand.vmem [shape: f32[256,80], index: 0, kind: input, shape index: {}]   ;;  %s1273_s3 = inlined_call_operand.vmem [shape: bf16[128,128], index: 3, kind: input, shape index: {}]   ;;  %s1274_s4 = inlined_call_operand.vmem [shape: f32[1,128], index: 4, kind: input, shape index: {}]   ;;  %s1275_s5 = inlined_call_operand.vmem [shape: bf16[128,128], index: 5, kind: input, shape index: {}]   ;;  %s1276_s6 = inlined_call_operand.vmem [shape: f32[1,128], index: 6, kind: input, shape index: {}]   ;;  %s1277_s7 = inlined_call_operand.vmem [shape: f32[256,128], index: 7, kind: output, shape index: {}]  }
   0x1   :  { %v807_v0 = vld [vmem:[%s1270_s1 + $0x20] sm:$0xff]  ;;  %v806_v1 = vld [vmem:[%s1270_s1 + $0x18] sm:$0xff]  ;;  %v805_v2 = vld [vmem:[%s1270_s1 + $0x10] sm:$0xff] }
   0x2   :  { %171 = vmatpush.bf16.msra.mxu0 %v807_v0  ;;  %824 = vmatpush.bf16.msra.mxu3 %v807_v0  ;;  %v804_v3 = vld [vmem:[%s1270_s1 + $0x8] sm:$0xff]  ;;  %v803_v4 = vld [vmem:[%s1270_s1] sm:$0xff]  ;;  %v29_v8 = vld [vmem:[%s1272_s0 + $0x10] sm:$0xff] }
   0x3   :  { %v27_v5 = vld [vmem:[%s1272_s0] sm:$0xff]  ;;  %v28_v6 = vld [vmem:[%s1272_s0 + $0x8] sm:$0xff]  ;;  %v30_v9 = vld [vmem:[%s1272_s0 + $0x18] sm:$0xff] }
   0x4   :  { %v59_v7 = vpack.c.bf16 %v28_v6, %v27_v5  ;;  %v60_v10 = vpack.c.bf16 %v30_v9, %v29_v8  ;;  %v31_v11 = vld [vmem:[%s1272_s0 + $0x20] sm:$0xff]  ;;  %v32_v12 = vld [vmem:[%s1272_s0 + $0x28] sm:$0xff]  ;;  %v33_v14 = vld [vmem:[%s1272_s0 + $0x30] sm:$0xff] }
   0x5   :  { %v61_v13 = vpack.c.bf16 %v32_v12, %v31_v11  ;;  %v34_v15 = vld [vmem:[%s1272_s0 + $0x38] sm:$0xff]  ;;  %v35_v17 = vld [vmem:[%s1272_s0 + $0x40] sm:$0xff]  ;;  %v36_v18 = vld [vmem:[%s1272_s0 + $0x48] sm:$0xff] }
   0x6   :  { %172 = vmatpush.bf16.msra.mxu0 %v806_v1  ;;  %825 = vmatpush.bf16.msra.mxu3 %v806_v1  ;;  %v62_v16 = vpack.c.bf16 %v34_v15, %v33_v14  ;;  %v63_v19 = vpack.c.bf16 %v36_v18, %v35_v17  ;;  %v815_v20 = vld [vmem:[%s1273_s3 + $0x38] sm:$0xff]  ;;  %v37_v21 = vld [vmem:[%s1272_s0 + $0x50] sm:$0xff]  ;;  %v813_v25 = vld [vmem:[%s1273_s3 + $0x28] sm:$0xff] }
   0x7   :  { %373 = vmatpush.bf16.msra.mxu1 %v815_v20  ;;  %v38_v22 = vld [vmem:[%s1272_s0 + $0x58] sm:$0xff]  ;;  %v814_v24 = vld [vmem:[%s1273_s3 + $0x30] sm:$0xff]  ;;  %v812_v26 = vld [vmem:[%s1273_s3 + $0x20] sm:$0xff] }
   0x8   :  { %v64_v23 = vpack.c.bf16 %v38_v22, %v37_v21  ;;  %v39_v27 = vld [vmem:[%s1272_s0 + $0x60] sm:$0xff]  ;;  %v40_v28 = vld [vmem:[%s1272_s0 + $0x68] sm:$0xff]  ;;  %v811_v29 = vld [vmem:[%s1273_s3 + $0x18] sm:$0xff] }
   0x9   :  { %v65_v30 = vpack.c.bf16 %v40_v28, %v39_v27  ;;  %v810_v31 = vld [vmem:[%s1273_s3 + $0x10] sm:$0xff]  ;;  %v809_v32 = vld [vmem:[%s1273_s3 + $0x8] sm:$0xff]  ;;  %v808_v33 = vld [vmem:[%s1273_s3] sm:$0xff] }
   0xa   :  { %173 = vmatpush.bf16.msra.mxu0 %v805_v2  ;;  %826 = vmatpush.bf16.msra.mxu3 %v805_v2  ;;  %v41_v34 = vld [vmem:[%s1272_s0 + $0x70] sm:$0xff]  ;;  %v42_v35 = vld [vmem:[%s1272_s0 + $0x78] sm:$0xff]  ;;  %v43_v37 = vld [vmem:[%s1272_s0 + $0x80] sm:$0xff] }
   0xb   :  { %374 = vmatpush.bf16.msra.mxu1 %v814_v24  ;;  %v66_v36 = vpack.c.bf16 %v42_v35, %v41_v34  ;;  %v44_v38 = vld [vmem:[%s1272_s0 + $0x88] sm:$0xff]  ;;  %v992_v41 = vld [vmem:[%s1271_s2] ss:$0 sm:$0xff]  ;;  %v45_v47 = vld [vmem:[%s1272_s0 + $0x90] sm:$0xff] }
   0xc   :  { %v67_v39 = vpack.c.bf16 %v44_v38, %v43_v37  ;;  %v46_v48 = vld [vmem:[%s1272_s0 + $0x98] sm:$0xff]  ;;  %v47_v57 = vld [vmem:[%s1272_s0 + $0xa0] sm:$0xff]  ;;  %v48_v58 = vld [vmem:[%s1272_s0 + $0xa8] sm:$0xff] }
   0xd   :  { %v68_v50 = vpack.c.bf16 %v46_v48, %v45_v47  ;;  %v69_v60 = vpack.c.bf16 %v48_v58, %v47_v57  ;;  %v53_v62 = vld [vmem:[%s1272_s0 + $0xd0] sm:$0xff]  ;;  %v54_v63 = vld [vmem:[%s1272_s0 + $0xd8] sm:$0xff]  ;;  %v55_v11 = vld [vmem:[%s1272_s0 + $0xe0] sm:$0xff] }
   0xe   :  { %174 = vmatpush.bf16.msra.mxu0 %v804_v3  ;;  %827 = vmatpush.bf16.msra.mxu3 %v804_v3  ;;  %v72_v0 = vpack.c.bf16 %v54_v63, %v53_v62  ;;  %v49_v6 = vld [vmem:[%s1272_s0 + $0xb0] sm:$0xff]  ;;  %v56_v12 = vld [vmem:[%s1272_s0 + $0xe8] sm:$0xff]  ;;  %v823_v37 = vld [vmem:[%s1275_s5 + $0x38] sm:$0xff] }
   0xf   :  { %375 = vmatpush.bf16.msra.mxu1 %v813_v25  ;;  %578 = vmatpush.bf16.msra.mxu2 %v823_v37 }
  0x12   :  { %175 = vmatpush.bf16.msra.mxu0 %v803_v4  ;;  %828 = vmatpush.bf16.msra.mxu3 %v803_v4 }
  0x13   :  { %376 = vmatpush.bf16.msra.mxu1 %v812_v26 }
  0x15   :  { %723 = vmatmul.msk.bf16.vlgmr.msra.gmra.mxu0 %vm119_vm0, %v59_v7  ;;  %736 = vmatmul.msk.bf16.vlgmr.msra.gmra.mxu3 %vm119_vm0, %v72_v0  ;;  %v50_v7 = vld [vmem:[%s1272_s0 + $0xb8] sm:$0xff] }
  0x16   :  { %829 = vmatpush.bf16.msrb.mxu3 %v815_v20  ;;  %v70_v9 = vpack.c.bf16 %v50_v7, %v49_v6  ;;  %v52_v20 = vld [vmem:[%s1272_s0 + $0xc8] sm:$0xff]  ;;  %v1089_v7 = vld [vmem:[%s1274_s4] ss:$0 sm:$0xff] }
  0x17   :  { %377 = vmatpush.bf16.msra.mxu1 %v811_v29 }
  0x1a   :  { %830 = vmatpush.bf16.msrb.mxu3 %v814_v24  ;;  %v57_v24 = vld [vmem:[%s1272_s0 + $0xf0] sm:$0xff] }
  0x1b   :  { %378 = vmatpush.bf16.msra.mxu1 %v810_v31 }
  0x1e   :  { %831 = vmatpush.bf16.msrb.mxu3 %v813_v25  ;;  %v58_v25 = vld [vmem:[%s1272_s0 + $0xf8] sm:$0xff] }
  0x1f   :  { %379 = vmatpush.bf16.msra.mxu1 %v809_v32 }
  0x22   :  { %832 = vmatpush.bf16.msrb.mxu3 %v812_v26  ;;  %v74_v26 = vpack.c.bf16 %v58_v25, %v57_v24 }
  0x23   :  { %380 = vmatpush.bf16.msra.mxu1 %v808_v33 }
  0x25   :  { %724 = vmatmul.msk.bf16.gmra.mxu0 %vm119_vm0, %v60_v10 }
  0x26   :  { %833 = vmatpush.bf16.msrb.mxu3 %v811_v29 }
  0x2a   :  { %834 = vmatpush.bf16.msrb.mxu3 %v810_v31 }
  0x2e   :  { %835 = vmatpush.bf16.msrb.mxu3 %v809_v32 }
  0x32   :  { %836 = vmatpush.bf16.msrb.mxu3 %v808_v33 }
  0x35   :  { %725 = vmatmul.msk.bf16.gmra.mxu0 %vm119_vm0, %v61_v13  ;;  %v73_v13 = vpack.c.bf16 %v56_v12, %v55_v11 }
  0x36   :  { %837 = vmatpush.bf16.msra.mxu3 %v823_v37 }
  0x37   :  { %737 = vmatmul.msk.bf16.gmra.mxu3 %vm119_vm0, %v73_v13 }
  0x45   :  { %726 = vmatmul.msk.bf16.gmra.mxu0 %vm119_vm0, %v62_v16 }
  0x47   :  { %738 = vmatmul.msk.bf16.gmra.mxu3 %vm119_vm0, %v74_v26 }
  0x55   :  { %727 = vmatmul.msk.bf16.gmra.mxu0 %vm119_vm0, %v63_v19  ;;  %v51_v19 = vld [vmem:[%s1272_s0 + $0xc0] sm:$0xff] }
  0x56   :  { %v71_v22 = vpack.c.bf16 %v52_v20, %v51_v19 }
  0x65   :  { %728 = vmatmul.msk.bf16.gmra.mxu0 %vm119_vm0, %v64_v23 }
  0x75   :  { %729 = vmatmul.msk.bf16.gmra.mxu0 %vm119_vm0, %v65_v30 }
  0x85   :  { %730 = vmatmul.msk.bf16.gmra.mxu0 %vm119_vm0, %v66_v36 }
  0x92   :  { %v177_v40 = vpop.f32.mrf.mxu0 }
  0x93   :  { %v178_v42 = vadd.f32 %v992_v41, %v177_v40 }
  0x95   :  { %731 = vmatmul.msk.bf16.gmra.mxu0 %vm119_vm0, %v67_v39  ;;  %v257_v45 = vmax.f32 %v178_v42, 0.0  ;;  %v822_v42 = vld [vmem:[%s1275_s5 + $0x30] sm:$0xff] }
  0x96   :  { %579 = vmatpush.bf16.msra.mxu2 %v822_v42  ;;  %838 = vmatpush.bf16.msra.mxu3 %v822_v42 }
  0x9a   :  { %v179_v43 = vpop.f32.mrf.mxu0 }
  0x9b   :  { %v180_v44 = vadd.f32 %v992_v41, %v179_v43 }
  0x9d   :  { %v258_v46 = vmax.f32 %v180_v44, 0.0  ;;  %v821_v44 = vld [vmem:[%s1275_s5 + $0x28] sm:$0xff] }
  0x9e   :  { %580 = vmatpush.bf16.msra.mxu2 %v821_v44  ;;  %839 = vmatpush.bf16.msra.mxu3 %v821_v44 }
  0x9f   :  { %v289_v49 = vpack.c.bf16 %v258_v46, %v257_v45  ;;  %v820_v45 = vld [vmem:[%s1275_s5 + $0x20] sm:$0xff] }
  0xa1   :  { %381 = vmatmul.bf16.vlgmr.msra.gmra.mxu1 %v289_v49  ;;  %v819_v49 = vld [vmem:[%s1275_s5 + $0x18] sm:$0xff] }
  0xa2   :  { %v182_v51 = vpop.f32.mrf.mxu0  ;;  %581 = vmatpush.bf16.msra.mxu2 %v820_v45  ;;  %840 = vmatpush.bf16.msra.mxu3 %v820_v45 }
  0xa3   :  { %v183_v52 = vadd.f32 %v992_v41, %v182_v51 }
  0xa5   :  { %732 = vmatmul.msk.bf16.gmra.mxu0 %vm119_vm0, %v68_v50  ;;  %v259_v55 = vmax.f32 %v183_v52, 0.0 }
  0xa6   :  { %582 = vmatpush.bf16.msra.mxu2 %v819_v49  ;;  %841 = vmatpush.bf16.msra.mxu3 %v819_v49 }
  0xaa   :  { %v184_v53 = vpop.f32.mrf.mxu0 }
  0xab   :  { %v185_v54 = vadd.f32 %v992_v41, %v184_v53  ;;  %v818_v53 = vld [vmem:[%s1275_s5 + $0x10] sm:$0xff] }
  0xac   :  { %583 = vmatpush.bf16.msra.mxu2 %v818_v53  ;;  %842 = vmatpush.bf16.msra.mxu3 %v818_v53 }
  0xad   :  { %v260_v56 = vmax.f32 %v185_v54, 0.0 }
  0xaf   :  { %v290_v59 = vpack.c.bf16 %v260_v56, %v259_v55  ;;  %v817_v55 = vld [vmem:[%s1275_s5 + $0x8] sm:$0xff]  ;;  %v816_v56 = vld [vmem:[%s1275_s5] sm:$0xff] }
  0xb0   :  { %584 = vmatpush.bf16.msra.mxu2 %v817_v55  ;;  %843 = vmatpush.bf16.msra.mxu3 %v817_v55 }
  0xb1   :  { %386 = vmatmul.bf16.gmra.mxu1 %v290_v59 }
  0xb2   :  { %v187_v61 = vpop.f32.mrf.mxu0 }
  0xb3   :  { %v188_v1 = vadd.f32 %v992_v41, %v187_v61 }
  0xb4   :  { %585 = vmatpush.bf16.msra.mxu2 %v816_v56  ;;  %844 = vmatpush.bf16.msra.mxu3 %v816_v56 }
  0xb5   :  { %733 = vmatmul.msk.bf16.gmra.mxu0 %vm119_vm0, %v69_v60  ;;  %v261_v4 = vmax.f32 %v188_v1, 0.0 }
  0xba   :  { %v189_v2 = vpop.f32.mrf.mxu0 }
  0xbb   :  { %v190_v3 = vadd.f32 %v992_v41, %v189_v2 }
  0xbd   :  { %v262_v5 = vmax.f32 %v190_v3, 0.0 }
  0xbf   :  { %v291_v8 = vpack.c.bf16 %v262_v5, %v261_v4 }
  0xc1   :  { %391 = vmatmul.bf16.gmra.mxu1 %v291_v8 }
  0xc2   :  { %v192_v10 = vpop.f32.mrf.mxu0 }
  0xc3   :  { %v193_v14 = vadd.f32 %v992_v41, %v192_v10 }
  0xc5   :  { %734 = vmatmul.msk.bf16.gmra.mxu0 %vm119_vm0, %v70_v9  ;;  %v263_v17 = vmax.f32 %v193_v14, 0.0 }
  0xca   :  { %v194_v15 = vpop.f32.mrf.mxu0 }
  0xcb   :  { %v195_v16 = vadd.f32 %v992_v41, %v194_v15 }
  0xcd   :  { %v264_v18 = vmax.f32 %v195_v16, 0.0 }
  0xcf   :  { %v292_v21 = vpack.c.bf16 %v264_v18, %v263_v17 }
  0xd1   :  { %396 = vmatmul.bf16.gmra.mxu1 %v292_v21 }
  0xd2   :  { %v197_v23 = vpop.f32.mrf.mxu0 }
  0xd3   :  { %v198_v27 = vadd.f32 %v992_v41, %v197_v23 }
  0xd5   :  { %735 = vmatmul.msk.bf16.gmra.mxu0 %vm119_vm0, %v71_v22  ;;  %v265_v30 = vmax.f32 %v198_v27, 0.0 }
  0xda   :  { %v199_v28 = vpop.f32.mrf.mxu0 }
  0xdb   :  { %v200_v29 = vadd.f32 %v992_v41, %v199_v28 }
  0xdd   :  { %v266_v31 = vmax.f32 %v200_v29, 0.0 }
  0xdf   :  { %v293_v32 = vpack.c.bf16 %v266_v31, %v265_v30 }
  0xe1   :  { %401 = vmatmul.bf16.gmra.mxu1 %v293_v32 }
  0xe2   :  { %v202_v33 = vpop.f32.mrf.mxu0 }
  0xe3   :  { %v203_v34 = vadd.f32 %v992_v41, %v202_v33 }
  0xe5   :  { %v267_v38 = vmax.f32 %v203_v34, 0.0 }
  0xea   :  { %v204_v35 = vpop.f32.mrf.mxu0 }
  0xeb   :  { %v205_v36 = vadd.f32 %v992_v41, %v204_v35 }
  0xed   :  { %v268_v39 = vmax.f32 %v205_v36, 0.0 }
  0xef   :  { %v294_v40 = vpack.c.bf16 %v268_v39, %v267_v38 }
  0xf1   :  { %406 = vmatmul.bf16.gmra.mxu1 %v294_v40 }
  0xf2   :  { %v207_v43 = vpop.f32.mrf.mxu0 }
  0xf3   :  { %v208_v46 = vadd.f32 %v992_v41, %v207_v43 }
  0xf5   :  { %v269_v50 = vmax.f32 %v208_v46, 0.0 }
  0xfa   :  { %v209_v47 = vpop.f32.mrf.mxu0 }
  0xfb   :  { %v210_v48 = vadd.f32 %v992_v41, %v209_v47 }
  0xfd   :  { %v270_v51 = vmax.f32 %v210_v48, 0.0 }
  0xff   :  { %v295_v52 = vpack.c.bf16 %v270_v51, %v269_v50 }
 0x101   :  { %411 = vmatmul.bf16.gmra.mxu1 %v295_v52  ;;  %v242_v52 = vpop.f32.mrf.mxu3 }
 0x102   :  { %v212_v54 = vpop.f32.mrf.mxu0 }
 0x103   :  { %v213_v57 = vadd.f32 %v992_v41, %v212_v54 }
 0x105   :  { %v271_v60 = vmax.f32 %v213_v57, 0.0 }
 0x10a   :  { %v214_v58 = vpop.f32.mrf.mxu0 }
 0x10b   :  { %v215_v59 = vadd.f32 %v992_v41, %v214_v58 }
 0x10d   :  { %v272_v61 = vmax.f32 %v215_v59, 0.0 }
 0x10f   :  { %v296_v62 = vpack.c.bf16 %v272_v61, %v271_v60 }
 0x111   :  { %416 = vmatmul.bf16.gmra.mxu1 %v296_v62  ;;  %v244_v62 = vpop.f32.mrf.mxu3 }
 0x112   :  { %v217_v63 = vpop.f32.mrf.mxu0 }
 0x113   :  { %v218_v0 = vadd.f32 %v992_v41, %v217_v63 }
 0x115   :  { %v273_v3 = vmax.f32 %v218_v0, 0.0 }
 0x11a   :  { %v219_v1 = vpop.f32.mrf.mxu0 }
 0x11b   :  { %v220_v2 = vadd.f32 %v992_v41, %v219_v1 }
 0x11d   :  { %v274_v4 = vmax.f32 %v220_v2, 0.0 }
 0x11e   :  { %v382_v5 = vpop.f32.mrf.mxu1 }
 0x11f   :  { %v297_v6 = vpack.c.bf16 %v274_v4, %v273_v3  ;;  %v383_v9 = vadd.f32 %v1089_v7, %v382_v5  ;;  %v247_v5 = vpop.f32.mrf.mxu3 }
 0x121   :  { %421 = vmatmul.bf16.gmra.mxu1 %v297_v6  ;;  %v462_v12 = vmax.f32 %v383_v9, 0.0  ;;  %v243_v6 = vadd.f32 %v992_v41, %v242_v52 }
 0x122   :  { %v222_v8 = vpop.f32.mrf.mxu0 }
 0x123   :  { %v223_v13 = vadd.f32 %v992_v41, %v222_v8  ;;  %v245_v8 = vadd.f32 %v992_v41, %v244_v62 }
 0x125   :  { %v275_v18 = vmax.f32 %v223_v13, 0.0  ;;  %v284_v13 = vmax.f32 %v245_v8, 0.0 }
 0x126   :  { %v384_v10 = vpop.f32.mrf.mxu1 }
 0x127   :  { %v385_v11 = vadd.f32 %v1089_v7, %v384_v10 }
 0x129   :  { %v463_v14 = vmax.f32 %v385_v11, 0.0 }
 0x12a   :  { %v224_v15 = vpop.f32.mrf.mxu0 }
 0x12b   :  { %v225_v16 = vadd.f32 %v992_v41, %v224_v15  ;;  %v494_v17 = vpack.c.bf16 %v463_v14, %v462_v12  ;;  %v283_v12 = vmax.f32 %v243_v6, 0.0 }
 0x12d   :  { %v276_v19 = vmax.f32 %v225_v16, 0.0  ;;  %586 = vmatmul.bf16.vlgmr.msra.gmra.mxu2 %v494_v17  ;;  %v302_v16 = vpack.c.bf16 %v284_v13, %v283_v12  ;;  %v249_v17 = vpop.f32.mrf.mxu3 }
 0x12e   :  { %v387_v20 = vpop.f32.mrf.mxu1 }
 0x12f   :  { %v298_v21 = vpack.c.bf16 %v276_v19, %v275_v18  ;;  %v388_v23 = vadd.f32 %v1089_v7, %v387_v20  ;;  %v248_v20 = vadd.f32 %v992_v41, %v247_v5 }
 0x131   :  { %426 = vmatmul.bf16.gmra.mxu1 %v298_v21  ;;  %v464_v26 = vmax.f32 %v388_v23, 0.0  ;;  %v250_v21 = vadd.f32 %v992_v41, %v249_v17 }
 0x132   :  { %v227_v22 = vpop.f32.mrf.mxu0 }
 0x133   :  { %v228_v27 = vadd.f32 %v992_v41, %v227_v22 }
 0x135   :  { %v277_v32 = vmax.f32 %v228_v27, 0.0  ;;  %v286_v27 = vmax.f32 %v250_v21, 0.0 }
 0x136   :  { %v389_v24 = vpop.f32.mrf.mxu1 }
 0x137   :  { %v390_v25 = vadd.f32 %v1089_v7, %v389_v24 }
 0x139   :  { %v465_v28 = vmax.f32 %v390_v25, 0.0  ;;  %v252_v25 = vpop.f32.mrf.mxu3 }
 0x13a   :  { %v229_v29 = vpop.f32.mrf.mxu0 }
 0x13b   :  { %v230_v30 = vadd.f32 %v992_v41, %v229_v29  ;;  %v495_v31 = vpack.c.bf16 %v465_v28, %v464_v26  ;;  %v285_v26 = vmax.f32 %v248_v20, 0.0 }
 0x13d   :  { %v278_v33 = vmax.f32 %v230_v30, 0.0  ;;  %591 = vmatmul.bf16.gmra.mxu2 %v495_v31  ;;  %v303_v30 = vpack.c.bf16 %v286_v27, %v285_v26 }
 0x13e   :  { %v392_v34 = vpop.f32.mrf.mxu1 }
 0x13f   :  { %v299_v35 = vpack.c.bf16 %v278_v33, %v277_v32  ;;  %v393_v37 = vadd.f32 %v1089_v7, %v392_v34  ;;  %v253_v34 = vadd.f32 %v992_v41, %v252_v25 }
 0x141   :  { %431 = vmatmul.bf16.gmra.mxu1 %v299_v35  ;;  %v466_v40 = vmax.f32 %v393_v37, 0.0  ;;  %v254_v31 = vpop.f32.mrf.mxu3 }
 0x142   :  { %v232_v36 = vpop.f32.mrf.mxu0  ;;  %v255_v35 = vadd.f32 %v992_v41, %v254_v31 }
 0x143   :  { %v233_v42 = vadd.f32 %v992_v41, %v232_v36 }
 0x145   :  { %v279_v47 = vmax.f32 %v233_v42, 0.0 }
 0x146   :  { %v394_v38 = vpop.f32.mrf.mxu1 }
 0x147   :  { %v395_v39 = vadd.f32 %v1089_v7, %v394_v38 }
 0x149   :  { %v467_v43 = vmax.f32 %v395_v39, 0.0  ;;  %v287_v39 = vmax.f32 %v253_v34, 0.0 }
 0x14a   :  { %v234_v44 = vpop.f32.mrf.mxu0 }
 0x14b   :  { %v235_v45 = vadd.f32 %v992_v41, %v234_v44  ;;  %v496_v46 = vpack.c.bf16 %v467_v43, %v466_v40  ;;  %v288_v40 = vmax.f32 %v255_v35, 0.0 }
 0x14d   :  { %v280_v48 = vmax.f32 %v235_v45, 0.0  ;;  %596 = vmatmul.bf16.gmra.mxu2 %v496_v46  ;;  %v304_v44 = vpack.c.bf16 %v288_v40, %v287_v39 }
 0x14e   :  { %v397_v49 = vpop.f32.mrf.mxu1 }
 0x14f   :  { %v300_v50 = vpack.c.bf16 %v280_v48, %v279_v47  ;;  %v398_v53 = vadd.f32 %v1089_v7, %v397_v49 }
 0x151   :  { %436 = vmatmul.bf16.gmra.mxu1 %v300_v50  ;;  %v468_v56 = vmax.f32 %v398_v53, 0.0 }
 0x152   :  { %v237_v51 = vpop.f32.mrf.mxu0 }
 0x153   :  { %v238_v57 = vadd.f32 %v992_v41, %v237_v51 }
 0x155   :  { %v281_v63 = vmax.f32 %v238_v57, 0.0  ;;  %v1126_v57 = vld [vmem:[%s1276_s6] ss:$0 sm:$0xff] }
 0x156   :  { %v399_v54 = vpop.f32.mrf.mxu1 }
 0x157   :  { %v400_v55 = vadd.f32 %v1089_v7, %v399_v54 }
 0x159   :  { %v469_v58 = vmax.f32 %v400_v55, 0.0 }
 0x15a   :  { %v239_v59 = vpop.f32.mrf.mxu0 }
 0x15b   :  { %v240_v60 = vadd.f32 %v992_v41, %v239_v59  ;;  %v497_v61 = vpack.c.bf16 %v469_v58, %v468_v56 }
 0x15d   :  { %v282_v0 = vmax.f32 %v240_v60, 0.0  ;;  %601 = vmatmul.bf16.gmra.mxu2 %v497_v61 }
 0x15e   :  { %v402_v1 = vpop.f32.mrf.mxu1 }
 0x15f   :  { %v301_v2 = vpack.c.bf16 %v282_v0, %v281_v63  ;;  %v403_v3 = vadd.f32 %v1089_v7, %v402_v1 }
 0x161   :  { %441 = vmatmul.bf16.vlgmr.msrb.gmra.mxu3 %v301_v2  ;;  %v470_v10 = vmax.f32 %v403_v3, 0.0 }
 0x166   :  { %v404_v4 = vpop.f32.mrf.mxu1 }
 0x167   :  { %v405_v9 = vadd.f32 %v1089_v7, %v404_v4 }
 0x169   :  { %v471_v11 = vmax.f32 %v405_v9, 0.0 }
 0x16b   :  { %v498_v14 = vpack.c.bf16 %v471_v11, %v470_v10 }
 0x16d   :  { %606 = vmatmul.bf16.gmra.mxu2 %v498_v14 }
 0x16e   :  { %v407_v15 = vpop.f32.mrf.mxu1 }
 0x16f   :  { %v408_v18 = vadd.f32 %v1089_v7, %v407_v15 }
 0x171   :  { %446 = vmatmul.bf16.gmra.mxu3 %v302_v16  ;;  %v472_v23 = vmax.f32 %v408_v18, 0.0 }
 0x176   :  { %v409_v19 = vpop.f32.mrf.mxu1 }
 0x177   :  { %v410_v22 = vadd.f32 %v1089_v7, %v409_v19 }
 0x179   :  { %v473_v24 = vmax.f32 %v410_v22, 0.0 }
 0x17b   :  { %v499_v28 = vpack.c.bf16 %v473_v24, %v472_v23 }
 0x17d   :  { %611 = vmatmul.bf16.gmra.mxu2 %v499_v28 }
 0x17e   :  { %v412_v29 = vpop.f32.mrf.mxu1 }
 0x17f   :  { %v413_v32 = vadd.f32 %v1089_v7, %v412_v29 }
 0x181   :  { %451 = vmatmul.bf16.gmra.mxu3 %v303_v30  ;;  %v474_v37 = vmax.f32 %v413_v32, 0.0 }
 0x186   :  { %v414_v33 = vpop.f32.mrf.mxu1 }
 0x187   :  { %v415_v36 = vadd.f32 %v1089_v7, %v414_v33 }
 0x189   :  { %v475_v38 = vmax.f32 %v415_v36, 0.0 }
 0x18b   :  { %v500_v42 = vpack.c.bf16 %v475_v38, %v474_v37 }
 0x18d   :  { %616 = vmatmul.bf16.gmra.mxu2 %v500_v42 }
 0x18e   :  { %v417_v43 = vpop.f32.mrf.mxu1 }
 0x18f   :  { %v418_v45 = vadd.f32 %v1089_v7, %v417_v43 }
 0x191   :  { %456 = vmatmul.bf16.gmra.mxu3 %v304_v44  ;;  %v476_v48 = vmax.f32 %v418_v45, 0.0 }
 0x196   :  { %v419_v46 = vpop.f32.mrf.mxu1 }
 0x197   :  { %v420_v47 = vadd.f32 %v1089_v7, %v419_v46 }
 0x199   :  { %v477_v49 = vmax.f32 %v420_v47, 0.0 }
 0x19b   :  { %v501_v50 = vpack.c.bf16 %v477_v49, %v476_v48 }
 0x19d   :  { %621 = vmatmul.bf16.gmra.mxu2 %v501_v50 }
 0x19e   :  { %v422_v41 = vpop.f32.mrf.mxu1 }
 0x19f   :  { %v423_v51 = vadd.f32 %v1089_v7, %v422_v41 }
 0x1a1   :  { %v478_v54 = vmax.f32 %v423_v51, 0.0 }
 0x1a6   :  { %v424_v52 = vpop.f32.mrf.mxu1 }
 0x1a7   :  { %v425_v53 = vadd.f32 %v1089_v7, %v424_v52 }
 0x1a9   :  { %v479_v55 = vmax.f32 %v425_v53, 0.0 }
 0x1ab   :  { %v502_v56 = vpack.c.bf16 %v479_v55, %v478_v54 }
 0x1ad   :  { %626 = vmatmul.bf16.gmra.mxu2 %v502_v56 }
 0x1ae   :  { %v427_v58 = vpop.f32.mrf.mxu1 }
 0x1af   :  { %v428_v61 = vadd.f32 %v1089_v7, %v427_v58 }
 0x1b0   :  { %v587_v59 = vpop.f32.mrf.mxu2 }
 0x1b1   :  { %v588_v60 = vadd.f32 %v1126_v57, %v587_v59  ;;  %v480_v1 = vmax.f32 %v428_v61, 0.0 }
 0x1b3   :  { %667 = vst [vmem:[%s1277_s7] sm:$0xff] %v588_v60 }
 0x1b6   :  { %v429_v62 = vpop.f32.mrf.mxu1 }
 0x1b7   :  { %v430_v63 = vadd.f32 %v1089_v7, %v429_v62 }
 0x1b8   :  { %v589_v0 = vpop.f32.mrf.mxu2 }
 0x1b9   :  { %v481_v2 = vmax.f32 %v430_v63, 0.0  ;;  %v590_v3 = vadd.f32 %v1126_v57, %v589_v0 }
 0x1bb   :  { %668 = vst [vmem:[%s1277_s7 + $0x8] sm:$0xff] %v590_v3  ;;  %v503_v4 = vpack.c.bf16 %v481_v2, %v480_v1 }
 0x1bd   :  { %631 = vmatmul.bf16.gmra.mxu2 %v503_v4 }
 0x1be   :  { %v432_v5 = vpop.f32.mrf.mxu1 }
 0x1bf   :  { %v433_v9 = vadd.f32 %v1089_v7, %v432_v5 }
 0x1c0   :  { %v592_v6 = vpop.f32.mrf.mxu2 }
 0x1c1   :  { %v593_v8 = vadd.f32 %v1126_v57, %v592_v6  ;;  %v482_v13 = vmax.f32 %v433_v9, 0.0 }
 0x1c3   :  { %669 = vst [vmem:[%s1277_s7 + $0x10] sm:$0xff] %v593_v8 }
 0x1c6   :  { %v434_v10 = vpop.f32.mrf.mxu1 }
 0x1c7   :  { %v435_v11 = vadd.f32 %v1089_v7, %v434_v10 }
 0x1c8   :  { %v594_v12 = vpop.f32.mrf.mxu2 }
 0x1c9   :  { %v483_v14 = vmax.f32 %v435_v11, 0.0  ;;  %v595_v15 = vadd.f32 %v1126_v57, %v594_v12 }
 0x1cb   :  { %670 = vst [vmem:[%s1277_s7 + $0x18] sm:$0xff] %v595_v15  ;;  %v504_v16 = vpack.c.bf16 %v483_v14, %v482_v13 }
 0x1cd   :  { %636 = vmatmul.bf16.gmra.mxu2 %v504_v16 }
 0x1ce   :  { %v437_v17 = vpop.f32.mrf.mxu1 }
 0x1cf   :  { %v438_v20 = vadd.f32 %v1089_v7, %v437_v17 }
 0x1d0   :  { %v597_v18 = vpop.f32.mrf.mxu2 }
 0x1d1   :  { %v598_v19 = vadd.f32 %v1126_v57, %v597_v18  ;;  %v484_v24 = vmax.f32 %v438_v20, 0.0 }
 0x1d3   :  { %671 = vst [vmem:[%s1277_s7 + $0x20] sm:$0xff] %v598_v19 }
 0x1d6   :  { %v439_v21 = vpop.f32.mrf.mxu1 }
 0x1d7   :  { %v440_v22 = vadd.f32 %v1089_v7, %v439_v21 }
 0x1d8   :  { %v599_v23 = vpop.f32.mrf.mxu2 }
 0x1d9   :  { %v485_v25 = vmax.f32 %v440_v22, 0.0  ;;  %v600_v26 = vadd.f32 %v1126_v57, %v599_v23 }
 0x1db   :  { %672 = vst [vmem:[%s1277_s7 + $0x28] sm:$0xff] %v600_v26  ;;  %v505_v27 = vpack.c.bf16 %v485_v25, %v484_v24 }
 0x1dd   :  { %641 = vmatmul.bf16.gmra.mxu2 %v505_v27 }
 0x1e0   :  { %v602_v28 = vpop.f32.mrf.mxu2 }
 0x1e1   :  { %v603_v29 = vadd.f32 %v1126_v57, %v602_v28 }
 0x1e3   :  { %673 = vst [vmem:[%s1277_s7 + $0x30] sm:$0xff] %v603_v29 }
 0x1e4   :  { %v442_v30 = vpop.f32.mrf.mxu3 }
 0x1e5   :  { %v443_v33 = vadd.f32 %v1089_v7, %v442_v30 }
 0x1e7   :  { %v486_v36 = vmax.f32 %v443_v33, 0.0 }
 0x1e8   :  { %v604_v31 = vpop.f32.mrf.mxu2 }
 0x1e9   :  { %v605_v32 = vadd.f32 %v1126_v57, %v604_v31 }
 0x1eb   :  { %674 = vst [vmem:[%s1277_s7 + $0x38] sm:$0xff] %v605_v32 }
 0x1ec   :  { %v444_v34 = vpop.f32.mrf.mxu3 }
 0x1ed   :  { %v445_v35 = vadd.f32 %v1089_v7, %v444_v34 }
 0x1ef   :  { %v487_v37 = vmax.f32 %v445_v35, 0.0 }
 0x1f0   :  { %v607_v38 = vpop.f32.mrf.mxu2 }
 0x1f1   :  { %v506_v39 = vpack.c.bf16 %v487_v37, %v486_v36  ;;  %v608_v40 = vadd.f32 %v1126_v57, %v607_v38 }
 0x1f3   :  { %675 = vst [vmem:[%s1277_s7 + $0x40] sm:$0xff] %v608_v40  ;;  %646 = vmatmul.bf16.vlgmr.msra.gmra.mxu3 %v506_v39 }
 0x1f4   :  { %v447_v42 = vpop.f32.mrf.mxu3 }
 0x1f5   :  { %v448_v45 = vadd.f32 %v1089_v7, %v447_v42 }
 0x1f7   :  { %v488_v48 = vmax.f32 %v448_v45, 0.0 }
 0x1f8   :  { %v609_v43 = vpop.f32.mrf.mxu2 }
 0x1f9   :  { %v610_v44 = vadd.f32 %v1126_v57, %v609_v43 }
 0x1fb   :  { %676 = vst [vmem:[%s1277_s7 + $0x48] sm:$0xff] %v610_v44 }
 0x1fc   :  { %v449_v46 = vpop.f32.mrf.mxu3 }
 0x1fd   :  { %v450_v47 = vadd.f32 %v1089_v7, %v449_v46 }
 0x1ff   :  { %v489_v49 = vmax.f32 %v450_v47, 0.0 }
 0x200   :  { %v612_v50 = vpop.f32.mrf.mxu2 }
 0x201   :  { %v613_v41 = vadd.f32 %v1126_v57, %v612_v50  ;;  %v507_v51 = vpack.c.bf16 %v489_v49, %v488_v48 }
 0x203   :  { %677 = vst [vmem:[%s1277_s7 + $0x50] sm:$0xff] %v613_v41  ;;  %651 = vmatmul.bf16.gmra.mxu3 %v507_v51 }
 0x204   :  { %v452_v52 = vpop.f32.mrf.mxu3 }
 0x205   :  { %v453_v55 = vadd.f32 %v1089_v7, %v452_v52 }
 0x207   :  { %v490_v59 = vmax.f32 %v453_v55, 0.0 }
 0x208   :  { %v614_v53 = vpop.f32.mrf.mxu2 }
 0x209   :  { %v615_v54 = vadd.f32 %v1126_v57, %v614_v53 }
 0x20b   :  { %678 = vst [vmem:[%s1277_s7 + $0x58] sm:$0xff] %v615_v54 }
 0x20c   :  { %v454_v56 = vpop.f32.mrf.mxu3 }
 0x20d   :  { %v455_v58 = vadd.f32 %v1089_v7, %v454_v56 }
 0x20f   :  { %v491_v60 = vmax.f32 %v455_v58, 0.0 }
 0x210   :  { %v617_v61 = vpop.f32.mrf.mxu2 }
 0x211   :  { %v618_v62 = vadd.f32 %v1126_v57, %v617_v61  ;;  %v508_v63 = vpack.c.bf16 %v491_v60, %v490_v59 }
 0x213   :  { %679 = vst [vmem:[%s1277_s7 + $0x60] sm:$0xff] %v618_v62  ;;  %656 = vmatmul.bf16.gmra.mxu3 %v508_v63 }
 0x214   :  { %v457_v0 = vpop.f32.mrf.mxu3 }
 0x215   :  { %v458_v3 = vadd.f32 %v1089_v7, %v457_v0 }
 0x217   :  { %v492_v6 = vmax.f32 %v458_v3, 0.0 }
 0x218   :  { %v619_v1 = vpop.f32.mrf.mxu2 }
 0x219   :  { %v620_v2 = vadd.f32 %v1126_v57, %v619_v1 }
 0x21b   :  { %680 = vst [vmem:[%s1277_s7 + $0x68] sm:$0xff] %v620_v2 }
 0x21c   :  { %v459_v4 = vpop.f32.mrf.mxu3 }
 0x21d   :  { %v460_v5 = vadd.f32 %v1089_v7, %v459_v4 }
 0x21f   :  { %v493_v8 = vmax.f32 %v460_v5, 0.0 }
 0x220   :  { %v622_v9 = vpop.f32.mrf.mxu2 }
 0x221   :  { %v623_v10 = vadd.f32 %v1126_v57, %v622_v9  ;;  %v509_v11 = vpack.c.bf16 %v493_v8, %v492_v6 }
 0x223   :  { %681 = vst [vmem:[%s1277_s7 + $0x70] sm:$0xff] %v623_v10  ;;  %661 = vmatmul.bf16.gmra.mxu3 %v509_v11 }
 0x228   :  { %v624_v12 = vpop.f32.mrf.mxu2 }
 0x229   :  { %v625_v13 = vadd.f32 %v1126_v57, %v624_v12 }
 0x22b   :  { %682 = vst [vmem:[%s1277_s7 + $0x78] sm:$0xff] %v625_v13 }
 0x230   :  { %v627_v14 = vpop.f32.mrf.mxu2 }
 0x231   :  { %v628_v7 = vadd.f32 %v1126_v57, %v627_v14 }
 0x233   :  { %683 = vst [vmem:[%s1277_s7 + $0x80] sm:$0xff] %v628_v7 }
 0x238   :  { %v629_v15 = vpop.f32.mrf.mxu2 }
 0x239   :  { %v630_v16 = vadd.f32 %v1126_v57, %v629_v15 }
 0x23b   :  { %684 = vst [vmem:[%s1277_s7 + $0x88] sm:$0xff] %v630_v16 }
 0x240   :  { %v632_v17 = vpop.f32.mrf.mxu2 }
 0x241   :  { %v633_v18 = vadd.f32 %v1126_v57, %v632_v17 }
 0x243   :  { %685 = vst [vmem:[%s1277_s7 + $0x90] sm:$0xff] %v633_v18 }
 0x248   :  { %v634_v19 = vpop.f32.mrf.mxu2 }
 0x249   :  { %v635_v20 = vadd.f32 %v1126_v57, %v634_v19 }
 0x24b   :  { %686 = vst [vmem:[%s1277_s7 + $0x98] sm:$0xff] %v635_v20 }
 0x250   :  { %v637_v21 = vpop.f32.mrf.mxu2 }
 0x251   :  { %v638_v22 = vadd.f32 %v1126_v57, %v637_v21 }
 0x253   :  { %687 = vst [vmem:[%s1277_s7 + $0xa0] sm:$0xff] %v638_v22 }
 0x258   :  { %v639_v23 = vpop.f32.mrf.mxu2 }
 0x259   :  { %v640_v24 = vadd.f32 %v1126_v57, %v639_v23 }
 0x25b   :  { %688 = vst [vmem:[%s1277_s7 + $0xa8] sm:$0xff] %v640_v24 }
 0x260   :  { %v642_v25 = vpop.f32.mrf.mxu2 }
 0x261   :  { %v643_v26 = vadd.f32 %v1126_v57, %v642_v25 }
 0x263   :  { %689 = vst [vmem:[%s1277_s7 + $0xb0] sm:$0xff] %v643_v26 }
 0x268   :  { %v644_v27 = vpop.f32.mrf.mxu2 }
 0x269   :  { %v645_v28 = vadd.f32 %v1126_v57, %v644_v27 }
 0x26b   :  { %690 = vst [vmem:[%s1277_s7 + $0xb8] sm:$0xff] %v645_v28 }
 0x276   :  { %v647_v29 = vpop.f32.mrf.mxu3 }
 0x277   :  { %v648_v30 = vadd.f32 %v1126_v57, %v647_v29 }
 0x279   :  { %691 = vst [vmem:[%s1277_s7 + $0xc0] sm:$0xff] %v648_v30 }
 0x27e   :  { %v649_v31 = vpop.f32.mrf.mxu3 }
 0x27f   :  { %v650_v32 = vadd.f32 %v1126_v57, %v649_v31 }
 0x281   :  { %692 = vst [vmem:[%s1277_s7 + $0xc8] sm:$0xff] %v650_v32 }
 0x286   :  { %v652_v33 = vpop.f32.mrf.mxu3 }
 0x287   :  { %v653_v34 = vadd.f32 %v1126_v57, %v652_v33 }
 0x289   :  { %693 = vst [vmem:[%s1277_s7 + $0xd0] sm:$0xff] %v653_v34 }
 0x28e   :  { %v654_v35 = vpop.f32.mrf.mxu3 }
 0x28f   :  { %v655_v36 = vadd.f32 %v1126_v57, %v654_v35 }
 0x291   :  { %694 = vst [vmem:[%s1277_s7 + $0xd8] sm:$0xff] %v655_v36 }
 0x296   :  { %v657_v37 = vpop.f32.mrf.mxu3 }
 0x297   :  { %v658_v38 = vadd.f32 %v1126_v57, %v657_v37 }
 0x299   :  { %695 = vst [vmem:[%s1277_s7 + $0xe0] sm:$0xff] %v658_v38 }
 0x29e   :  { %v659_v39 = vpop.f32.mrf.mxu3 }
 0x29f   :  { %v660_v40 = vadd.f32 %v1126_v57, %v659_v39 }
 0x2a1   :  { %696 = vst [vmem:[%s1277_s7 + $0xe8] sm:$0xff] %v660_v40 }
 0x2a6   :  { %v662_v42 = vpop.f32.mrf.mxu3 }
 0x2a7   :  { %v663_v43 = vadd.f32 %v1126_v57, %v662_v42 }
 0x2a9   :  { %697 = vst [vmem:[%s1277_s7 + $0xf0] sm:$0xff] %v663_v43 }
 0x2ae   :  { %v664_v44 = vpop.f32.mrf.mxu3 }
 0x2af   :  { %v665_v45 = vadd.f32 %v1126_v57, %v664_v44 }
 0x2b1   :  { %698 = vst [vmem:[%s1277_s7 + $0xf8] sm:$0xff] %v665_v45 }

</bundles_post_ra>
